<compile_context>
chip_gen: v7x
topology: tpu7x:2x2x1
jax: 0.10.0
libtpu: 0.0.40
codegen_flags: <defaults>
</compile_context>

<pallas_src>
import functools

import jax
import jax.numpy as jnp
from jax import lax
from jax.experimental import pallas as pl
from jax.experimental.pallas import tpu as pltpu


def _cos_m_theta(c, m):
    """Horner-form Chebyshev cos(m*theta) for m >= 2 (c = cos(theta))."""
    c2 = c * c
    if m == 2:
        return 2.0 * c2 - 1.0
    if m == 3:
        return (4.0 * c2 - 3.0) * c
    if m == 4:
        return (8.0 * c2 - 8.0) * c2 + 1.0
    if m == 5:
        return ((16.0 * c2 - 20.0) * c2 + 5.0) * c
    raise ValueError(f"unsupported margin m={m}")


def _aa_margin_kernel(x_ref, w_ref, inv_xlen_ref, inv_col_ref, out_ref, *, m):
    # MXU matmul in storage dtype, f32 accumulate.
    cos = jnp.dot(x_ref[...], w_ref[...], preferred_element_type=jnp.float32)
    cos = cos * inv_xlen_ref[...]            # (tb, 1) broadcast over lanes
    cos = cos * inv_col_ref[...]             # (1, to) broadcast over sublanes
    cos = jnp.clip(cos, -1.0, 1.0)
    if m >= 2:
        cos = jnp.minimum(cos, _cos_m_theta(cos, m))
    # m == 0: min(cos, 1) == cos after clamp; m == 1: min(cos, cos) == cos.
    out_ref[...] = cos.astype(out_ref.dtype)


def _round_up(n, k):
    return -(-n // k) * k


def _pick_tile(dim, candidates, unit_bytes, byte_budget):
    """Largest candidate dividing dim whose (double-buffered) tile fits budget."""
    divisors = [c for c in candidates if dim % c == 0]   # descending order
    if not divisors:
        return dim
    for c in divisors:
        if c * unit_bytes <= byte_budget:
            return c
    return divisors[-1]


def _vmem_capacity_bytes():
    try:
        return int(pltpu.get_tpu_info().vmem_capacity_bytes)
    except Exception:
        return 64 * 1024 * 1024   # conservative fallback (v7x per-TensorCore)


def aa_margin_forward(x, w, m=1):
    B, IN = x.shape
    IN2, OUT = w.shape
    assert IN == IN2, (IN, IN2)

    out_dtype = jnp.result_type(x.dtype, w.dtype)

    # Norms computed once (full IN) outside the kernel; renorm/wlen cancel to
    # a plain division by the raw column norm.  Zero rows/cols are undefined
    # here exactly as they are in the PyTorch reference.
    xf = x.astype(jnp.float32)
    wf = w.astype(jnp.float32)
    inv_xlen = lax.rsqrt(jnp.sum(xf * xf, axis=1, keepdims=True))   # (B, 1)
    inv_col = lax.rsqrt(jnp.sum(wf * wf, axis=0, keepdims=True))    # (1, OUT)

    # Pad to (sublane, lane) multiples so blocks are aligned and output stores
    # are unmasked; padded positions get inverse-norm 0 -> exact zeros.
    B_pad = _round_up(B, 8)
    OUT_pad = _round_up(OUT, 128)
    if B_pad != B:
        x = jnp.pad(x, ((0, B_pad - B), (0, 0)))
        inv_xlen = jnp.pad(inv_xlen, ((0, B_pad - B), (0, 0)))
    if OUT_pad != OUT:
        w = jnp.pad(w, ((0, 0), (0, OUT_pad - OUT)))
        inv_col = jnp.pad(inv_col, ((0, 0), (0, OUT_pad - OUT)))

    vmem_cap = _vmem_capacity_bytes()
    x_bytes = jnp.dtype(x.dtype).itemsize
    w_bytes = jnp.dtype(w.dtype).itemsize
    o_bytes = jnp.dtype(out_dtype).itemsize

    # Byte-bounded tile selection: W gets ~1/4 of VMEM (double-buffered),
    # x + out together ~1/8, leaving headroom for the pipeline.
    to = _pick_tile(OUT_pad, (2048, 1024, 512, 256, 128),
                    unit_bytes=2 * IN * w_bytes,
                    byte_budget=vmem_cap // 4)
    tb = _pick_tile(B_pad, (512, 256, 128, 64, 32, 16, 8),
                    unit_bytes=2 * (IN * x_bytes + to * o_bytes),
                    byte_budget=vmem_cap // 8)

    # OUT-tile axis outermost, batch innermost: each W block is fetched from
    # HBM once and stays resident while x blocks re-stream.
    grid = (OUT_pad // to, B_pad // tb)

    kernel = functools.partial(_aa_margin_kernel, m=m)

    cost = pl.CostEstimate(
        flops=2 * B * IN * OUT + 6 * B * OUT,
        transcendentals=0,
        bytes_accessed=(B * IN * x_bytes + IN * OUT * w_bytes
                        + B * OUT * o_bytes),
    )

    out = pl.pallas_call(
        kernel,
        out_shape=jax.ShapeDtypeStruct((B_pad, OUT_pad), out_dtype),
        grid_spec=pltpu.PrefetchScalarGridSpec(
            num_scalar_prefetch=0,
            grid=grid,
            in_specs=[
                pl.BlockSpec((tb, IN), lambda o, b: (b, 0)),   # x (re-streamed)
                pl.BlockSpec((IN, to), lambda o, b: (0, o)),   # w (inner-loop invariant)
                pl.BlockSpec((tb, 1), lambda o, b: (b, 0)),    # 1/||x_row||
                pl.BlockSpec((1, to), lambda o, b: (0, o)),    # 1/||w_col||
            ],
            out_specs=pl.BlockSpec((tb, to), lambda o, b: (b, o)),
        ),
        compiler_params=pltpu.CompilerParams(
            dimension_semantics=("parallel", "parallel"),
            vmem_limit_bytes=min(int(vmem_cap * 3 // 4), 96 * 1024 * 1024),
        ),
        cost_estimate=cost,
    )(x, w, inv_xlen, inv_col)

    if B_pad != B or OUT_pad != OUT:
        out = out[:B, :OUT]
    return out


def _reference(x, w, m=1):
    """Pure-JAX mirror of the literal PyTorch forward sequence."""
    mlambda = [
        lambda c: c ** 0,
        lambda c: c ** 1,
        lambda c: 2.0 * c ** 2 - 1.0,
        lambda c: 4.0 * c ** 3 - 3.0 * c,
        lambda c: 8.0 * c ** 4 - 8.0 * c ** 2 + 1.0,
        lambda c: 16.0 * c ** 5 - 20.0 * c ** 3 + 5.0 * c,
    ]
    col_norm = jnp.sqrt(jnp.sum(w * w, axis=0, keepdims=True))
    ww = w * jnp.where(col_norm > 1e-5, 1e-5 / col_norm, 1.0) * 1e5
    xlen = jnp.sqrt(jnp.sum(x * x, axis=1, keepdims=True))
    wlen = jnp.sqrt(jnp.sum(ww * ww, axis=0, keepdims=True))
    cos = jnp.clip((x @ ww) / xlen / wlen, -1.0, 1.0)
    return jnp.minimum(cos, mlambda[m](cos))


def _make_weight(key, in_features, out_features):
    # Parameter init matching the module: U(-1,1) then renorm(2,1,1e-5).mul(1e5).
    w_raw = jax.random.uniform(key, (in_features, out_features),
                               dtype=jnp.float32, minval=-1.0, maxval=1.0)
    n = jnp.sqrt(jnp.sum(w_raw * w_raw, axis=0, keepdims=True))
    return w_raw * jnp.where(n > 1e-5, 1e-5 / n, 1.0) * 1e5


if __name__ == "__main__":
    B, IN_FEATURES, OUT_FEATURES = 8, 32, 128

    key = jax.random.PRNGKey(0)
    kx, kw = jax.random.split(key)
    weight = _make_weight(kw, IN_FEATURES, OUT_FEATURES)
    x = jax.random.normal(kx, (B, IN_FEATURES), dtype=jnp.float32)

    # Default margin (m=1), as in the module constructor.
    out = aa_margin_forward(x, weight, m=1)
    jax.block_until_ready(out)
    ref = _reference(x, weight, m=1)
    assert out.shape == (B, OUT_FEATURES)
    assert jnp.allclose(out, ref, atol=1e-4, rtol=1e-4)

    # Horner polynomial path (m=4).
    out4 = aa_margin_forward(x, weight, m=4)
    jax.block_until_ready(out4)
    ref4 = _reference(x, weight, m=4)
    assert jnp.allclose(out4, ref4, atol=1e-4, rtol=1e-4)

    # Ragged shapes exercise the padding / lane-dense store path (m=3).
    kx2, kw2 = jax.random.split(jax.random.PRNGKey(1))
    B2, OUT2 = 5, 200
    w2 = _make_weight(kw2, IN_FEATURES, OUT2)
    x2 = jax.random.normal(kx2, (B2, IN_FEATURES), dtype=jnp.float32)
    out3 = aa_margin_forward(x2, w2, m=3)
    jax.block_until_ready(out3)
    ref3 = _reference(x2, w2, m=3)
    assert out3.shape == (B2, OUT2)
    assert jnp.allclose(out3, ref3, atol=1e-4, rtol=1e-4)

    print("KERNEL_OK")
</pallas_src>

<mosaic_0001>
module attributes {stable_mosaic.version = 11 : i64} {
  func.func @_aa_margin_kernel(%arg0: i32, %arg1: i32, %arg2: memref<8x32xf32, #tpu.memory_space<vmem>>, %arg3: memref<32x128xf32, #tpu.memory_space<vmem>>, %arg4: memref<8x1xf32, #tpu.memory_space<vmem>>, %arg5: memref<1x128xf32, #tpu.memory_space<vmem>>, %arg6: memref<8x128xf32, #tpu.memory_space<vmem>>) attributes {dimension_semantics = [#tpu.dimension_semantics<parallel>, #tpu.dimension_semantics<parallel>], iteration_bounds = array<i64: 1, 1>, scalar_prefetch = 0 : i64, scratch_operands = 0 : i64, tpu.core_type = #tpu.core_type<tc>, window_params = [{transform_indices = @transform_0, window_bounds = array<i64: 8, 32>}, {transform_indices = @transform_1, window_bounds = array<i64: 32, 128>}, {transform_indices = @transform_2, window_bounds = array<i64: 8, 1>}, {transform_indices = @transform_3, window_bounds = array<i64: 1, 128>}, {transform_indices = @transform_4, window_bounds = array<i64: 8, 128>}]} {
    %c0 = arith.constant 0 : index
    %c0_0 = arith.constant 0 : index
    %0 = vector.load %arg2[%c0, %c0_0] : memref<8x32xf32, #tpu.memory_space<vmem>>, vector<8x32xf32>
    %c0_1 = arith.constant 0 : index
    %c0_2 = arith.constant 0 : index
    %1 = vector.load %arg3[%c0_1, %c0_2] : memref<32x128xf32, #tpu.memory_space<vmem>>, vector<32x128xf32>
    %cst = arith.constant dense<0.000000e+00> : vector<8x128xf32>
    %2 = tpu.matmul %0, %1, %cst {dimension_numbers = #tpu.dot_dimension_numbers<[1], [0], [0], [1], [0, 0, 1, 1], [], []>} : vector<8x32xf32>, vector<32x128xf32>, vector<8x128xf32> -> vector<8x128xf32>
    %c0_3 = arith.constant 0 : index
    %c0_4 = arith.constant 0 : index
    %3 = vector.load %arg4[%c0_3, %c0_4] : memref<8x1xf32, #tpu.memory_space<vmem>>, vector<8x1xf32>
    %4 = vector.broadcast %3 : vector<8x1xf32> to vector<8x128xf32>
    %5 = arith.mulf %2, %4 : vector<8x128xf32>
    %c0_5 = arith.constant 0 : index
    %c0_6 = arith.constant 0 : index
    %6 = vector.load %arg5[%c0_5, %c0_6] : memref<1x128xf32, #tpu.memory_space<vmem>>, vector<1x128xf32>
    %7 = vector.broadcast %6 : vector<1x128xf32> to vector<8x128xf32>
    %8 = arith.mulf %5, %7 : vector<8x128xf32>
    %cst_7 = arith.constant -1.000000e+00 : f32
    %cst_8 = arith.constant 1.000000e+00 : f32
    %9 = vector.broadcast %cst_7 : f32 to vector<8x128xf32>
    %10 = arith.maximumf %9, %8 : vector<8x128xf32>
    %11 = vector.broadcast %cst_8 : f32 to vector<8x128xf32>
    %12 = arith.minimumf %11, %10 : vector<8x128xf32>
    %c0_9 = arith.constant 0 : index
    %c0_10 = arith.constant 0 : index
    %13 = vector.load %arg6[%c0_9, %c0_10] : memref<8x128xf32, #tpu.memory_space<vmem>>, vector<8x128xf32>
    tpu.vector_store %arg6[%c0_9, %c0_10], %12 {strides = array<i32>} : memref<8x128xf32, #tpu.memory_space<vmem>>, vector<8x128xf32>,
    return
  }
  func.func @transform_0(%arg0: i32, %arg1: i32) -> (i32, i32) {
    %c0_i32 = arith.constant 0 : i32
    %c0_i32_0 = arith.constant 0 : i32
    return %arg1, %c0_i32 : i32, i32
  }
  func.func @transform_1(%arg0: i32, %arg1: i32) -> (i32, i32) {
    %c0_i32 = arith.constant 0 : i32
    %c0_i32_0 = arith.constant 0 : i32
    return %c0_i32, %arg0 : i32, i32
  }
  func.func @transform_2(%arg0: i32, %arg1: i32) -> (i32, i32) {
    %c0_i32 = arith.constant 0 : i32
    %c0_i32_0 = arith.constant 0 : i32
    return %arg1, %c0_i32 : i32, i32
  }
  func.func @transform_3(%arg0: i32, %arg1: i32) -> (i32, i32) {
    %c0_i32 = arith.constant 0 : i32
    %c0_i32_0 = arith.constant 0 : i32
    return %c0_i32, %arg0 : i32, i32
  }
  func.func @transform_4(%arg0: i32, %arg1: i32) -> (i32, i32) {
    %c0_i32 = arith.constant 0 : i32
    return %arg1, %arg0 : i32, i32
  }
}

</mosaic_0001>

<bundles_post_ra>
// kernel: tpu_custom_call.1
= control target key start
LH: loop header
LB: loop body
LE: loop exit
PB: predicated region body
PF: predicated region fallthrough
CT: control target
= control target key end

     0   :  { %9 = vsyncpa [#allocation3], 0  ;;  %s292_s0 = inlined_call_operand.vmem [shape: f32[8,32], index: 0, kind: input, shape index: {}]   ;;  %s293_s1 = inlined_call_operand.hbm [shape: f32[32,128], index: 1, kind: input, shape index: {}]   ;;  %s294_s2 = inlined_call_operand.vmem [shape: f32[8,1], index: 2, kind: input, shape index: {}]   ;;  %s295_s3 = inlined_call_operand.vmem [shape: f32[1,128], index: 3, kind: input, shape index: {}]   ;;  %s296_s4 = inlined_call_operand.hbm [shape: f32[8,128], index: 4, kind: output, shape index: {}]  }
   0x1   :  { %10 = vsyncpa [#allocation4], 0  ;;  %s226_s15 = smov [#allocation2]   ;;  %s178_s19 = scalar_lea.hbm %s293_s1, 512 }
   0x2   :  { %s18_s16 = sshll.u32 %s226_s15, 4  ;;  %p179_p0 = scmp.ne.s32.totalorder %s293_s1, %s178_s19  ;;  %s19_s16 = int_to_ptr.vmem [resolvable:$true] %s18_s16 }
   0x3   :  { %p182_p1 = scmp.lt.u32.totalorder %s178_s19, %s293_s1 }
   0x5   :  { %p184_p2 = pnand %p182_p1, %p179_p0 }
   0x7   :  { %187 = shalt.err (!%p184_p2)
}
   0x8   :  { %s188_s24 = scalar_lea.vmem %s19_s16, 512  ;;  %p193_p4 = scmp.lt.s32.totalorder %s19_s16, %s19_s16 }
   0x9   :  { %p189_p3 = scmp.ne.s32.totalorder %s19_s16, %s188_s24  ;;  %p194_p5 = scmp.lt.s32.totalorder %s188_s24, %s188_s24 }
   0xb   :  { %p195_p6 = por %p194_p5, %p193_p4 }
   0xd   :  { %p196_p7 = pnand %p195_p6, %p189_p3 }
   0xf   :  { %199 = shalt.err (!%p196_p7)
}
  0x10   :  { %s227_s25 = smov 128   ;;  %s228_s26 = smov 8  }
  0x11   :  { %24 = dma.hbm_to_vmem [thread:$0]  %s293_s1, 512, %s19_s16, [#allocation3], %s227_s25, %s227_s25, %s228_s26  }
  0x12   :  { %222 = dma.done.wait [#allocation3], 512  }
  0x13   :  { %223 = vsyncadd [#allocation3], 4294966784  ;;  %v229_v0 = vmov 0.0|0.0   ;;  %vm230_vm0 = vmmov 0   ;;  %v231_v1 = vmov 0.0   ;;  %v232_v2 = vmov 0  }
  0x14   :  { %163 = vmatprep.subr.bf16.mxu0 %v229_v0  ;;  %160 = vmatprep.mubr.msk.f32.mxu0 %vm230_vm0, %v231_v1  ;;  %v33_v3 = vld [vmem:[#allocation2] sm:$0xff]  ;;  %v34_v4 = vld [vmem:[#allocation2 + $0x8] sm:$0xff]  ;;  %v35_v5 = vld [vmem:[#allocation2 + $0x10] sm:$0xff]  ;;  %vm37_vm1 = vcmask 261120  }
  0x15   :  { %177 = vset.pattern.permute.xlu0 %v232_v2  ;;  %v164_v6 = vpack.c.bf16 %v34_v4, %v33_v3  ;;  %v36_v7 = vld [vmem:[#allocation2 + $0x18] sm:$0xff]  ;;  %v111_v8 = vld [vmem:[%s294_s2] sm:$0xff]  ;;  %s233_s2 = smov [#allocation5]  }
  0x16   :  { %114 = vperm.xlu0 %177, %v111_v8   ;;  %v167_v9 = vpack.c.bf16 %v36_v7, %v35_v5  ;;  %v32_v10 = vld [vmem:[%s292_s0] sm:$0xff]  ;;  %s135_s8 = sshll.u32 %s233_s2, 4  ;;  %s136_s8 = int_to_ptr.vmem [resolvable:$true] %s135_s8 }
  0x17   :  { %165 = vmatpush3.bf16.msra.mxu0 %v164_v6  ;;  %v145_v13 = vld [vmem:[%s295_s3] ss:$0 sm:$0xff]  ;;  %s200_s9 = scalar_lea.vmem %s136_s8, 128  ;;  %p205_p9 = scmp.lt.s32.totalorder %s136_s8, %s136_s8 }
  0x18   :  { %166 = vmatprep.subr.bf16.mxu0 %v229_v0  ;;  %p201_p8 = scmp.ne.s32.totalorder %s136_s8, %s200_s9  ;;  %p206_p10 = scmp.lt.s32.totalorder %s200_s9, %s200_s9 }
  0x1a   :  { %p207_p11 = por %p206_p10, %p205_p9 }
  0x1b   :  { %168 = vmatpush3.bf16.msra.mxu0 %v167_v9 }
  0x1c   :  { %p208_p12 = pnand %p207_p11, %p201_p8 }
  0x1e   :  { %161 = vmatmul.mubr.msk.f32.vlgmr.msra.gmra.mrb[0].mxu0 %vm37_vm1, %v32_v10 }
  0x95   :  { %v115_v11 = vpop.permute.xlu0 %114 }
  0xf1   :  { %v107_v12 = vpop.f32.mrb[0].mxu0 }
  0xf2   :  { %v117_v14 = vmul.f32 %v115_v11, %v107_v12  ;;  %v162_v15 = vpop.f32.mrb[1].mxu0 }
  0xf4   :  { %v125_v16 = vmul.f32 %v145_v13, %v117_v14 }
  0xf6   :  { %v146_v17 = vclamps-f32 %v125_v16, 1.0 }
  0xf8   :  { %128 = vst [vmem:[#allocation5] sm:$0xff] %v146_v17 }
  0xf9   :  { %211 = shalt.err (!%p208_p12)
}
  0xfa   :  { %s212_s11 = scalar_lea.hbm %s296_s4, 128 }
  0xfb   :  { %p213_p13 = scmp.ne.s32.totalorder %s296_s4, %s212_s11  ;;  %p216_p0 = scmp.lt.u32.totalorder %s212_s11, %s296_s4 }
  0xfd   :  { %p218_p1 = pnand %p216_p0, %p213_p13 }
  0xff   :  { %221 = shalt.err (!%p218_p1)
}
 0x100   :  { %138 = dma.vmem_to_hbm [thread:$0]  %s136_s8, 128, %s296_s4, [#allocation4]  }
 0x101   :  { %224 = dma.done.wait [#allocation4], 128  }
 0x102   :  { %225 = vsyncadd [#allocation4], 4294967168 }
 0x103   :  { %142 = vsyncpa [#allocation3], 1 }
 0x104   :  { %143 = vsyncpa [#allocation4], 1 }

</bundles_post_ra>
